<compile_context>
chip_gen: v7x
topology: tpu7x:2x2x1
jax: 0.10.0
libtpu: 0.0.40
codegen_flags: <defaults>
</compile_context>

<pallas_src>
import jax
import jax.numpy as jnp
from jax.experimental import pallas as pl
from jax.experimental.pallas import tpu as pltpu


# ---------------------------------------------------------------------------
# Fused kernel: BN + ReLU + 1x1 conv + 3x3 conv (pad=1) for one row tile.
# ---------------------------------------------------------------------------
def _make_kernel(TH, W, C_in, C_mid, C_out, num_t):
    def kernel(x_ref, halo_ref, scale_ref, shift_ref, w1_ref, w2_ref,
               o_ref, bpad_ref):
        # x_ref:     [TH, W, C_in]      center rows of this tile
        # halo_ref:  [2, W, C_in]       row above / row below the tile
        # scale_ref: [1, 1, C_in]       gamma / sqrt(var + eps)
        # shift_ref: [1, 1, C_in]       beta - mean * scale
        # w1_ref:    [C_in, C_mid]      1x1 conv weight (bf16)
        # w2_ref:    [3, 3, C_mid, C_out]  3x3 conv weight, HWIO (bf16)
        # o_ref:     [TH, W, C_out]
        # bpad_ref:  [TH+2, W+2, C_mid] f32 scratch: zero-padded bottleneck
        h = pl.program_id(1)

        scale = scale_ref[...]
        shift = shift_ref[...]
        w1 = w1_ref[...]

        # ---- BN + ReLU + 1x1 conv for the TH center rows ----
        x_c = x_ref[...].astype(jnp.float32)
        y_c = jnp.maximum(x_c * scale + shift, 0.0)
        y_c = y_c.reshape(TH * W, C_in).astype(jnp.bfloat16)
        b_c = jnp.dot(y_c, w1, preferred_element_type=jnp.float32)
        bpad_ref[1:TH + 1, 1:W + 1, :] = b_c.reshape(TH, W, C_mid)

        # ---- same for the two halo rows (recomputed, tiny matmul) ----
        x_h = halo_ref[...].astype(jnp.float32)
        y_h = jnp.maximum(x_h * scale + shift, 0.0)
        y_h = y_h.reshape(2 * W, C_in).astype(jnp.bfloat16)
        b_h = jnp.dot(y_h, w1, preferred_element_type=jnp.float32)
        b_h = b_h.reshape(2, W, C_mid)
        bpad_ref[0:1, 1:W + 1, :] = b_h[0:1]
        bpad_ref[TH + 1:TH + 2, 1:W + 1, :] = b_h[1:2]

        # ---- zero-pad the left / right columns (conv2 padding=1 in W) ----
        zcol = jnp.zeros((TH + 2, 1, C_mid), jnp.float32)
        bpad_ref[:, 0:1, :] = zcol
        bpad_ref[:, W + 1:W + 2, :] = zcol

        # ---- conv2's H padding must be exactly zero at image boundaries.
        # The wrapper puts x=0 in the boundary halo rows, but BN(0) != 0, so
        # mask the corresponding bottleneck rows to true zeros here.
        zrow = jnp.zeros((1, W + 2, C_mid), jnp.float32)

        @pl.when(h == 0)
        def _():
            bpad_ref[0:1, :, :] = zrow

        @pl.when(h == num_t - 1)
        def _():
            bpad_ref[TH + 1:TH + 2, :, :] = zrow

        # ---- 3x3 conv: 9 flattened 2-D MXU matmuls, accumulated in f32 ----
        acc = jnp.zeros((TH * W, C_out), jnp.float32)
        for dy in range(3):
            for dx in range(3):
                patch = bpad_ref[dy:dy + TH, dx:dx + W, :]         # [TH, W, C_mid]
                patch = patch.reshape(TH * W, C_mid).astype(jnp.bfloat16)
                acc = acc + jnp.dot(patch, w2_ref[dy, dx],
                                    preferred_element_type=jnp.float32)

        o_ref[...] = acc.reshape(TH, W, C_out).astype(o_ref.dtype)

    return kernel


def _pick_tile_h(H, requested=None):
    """Row-tile height: must divide H and (for the out BlockSpec) be a multiple
    of 8 or equal H."""
    if requested is not None and H % requested == 0 and (requested % 8 == 0
                                                         or requested == H):
        return requested
    for cand in (64, 56, 48, 40, 32, 24, 16, 8):
        if cand <= H and H % cand == 0:
            return cand
    return H


# ---------------------------------------------------------------------------
# Wrapper
# ---------------------------------------------------------------------------
def dense_layer_forward(x_nchw, params, *, drop_rate=0.0, eps=1e-5, block_h=None):
    """x_nchw: [N, C_in, H, W] float32. Returns [N, C_in + growth_rate, H, W]."""
    gamma = params["gamma"]
    beta = params["beta"]
    mean = params["running_mean"]
    var = params["running_var"]
    w1 = params["w1"]            # [C_in, C_mid]
    w2 = params["w2"]            # [3, 3, C_mid, C_out]  (HWIO)

    N, C_in, H, W = x_nchw.shape
    C_mid = w1.shape[1]
    C_out = w2.shape[3]

    TH = _pick_tile_h(H, block_h)
    num_t = H // TH

    # ---- XLA glue: layout + BN folding (cheap, once per call) ----
    x_nhwc = jnp.transpose(x_nchw, (0, 2, 3, 1))                  # [N,H,W,C_in]

    scale = (gamma / jnp.sqrt(var + eps)).astype(jnp.float32)
    shift = (beta - mean * scale).astype(jnp.float32)
    scale = scale.reshape(1, 1, C_in)
    shift = shift.reshape(1, 1, C_in)

    w1_b = w1.astype(jnp.bfloat16)
    w2_b = w2.astype(jnp.bfloat16)

    # Per-tile halo rows (tiny): halo[n, 2t]   = x row (t*TH - 1), zeros at top edge
    #                            halo[n, 2t+1] = x row (t*TH + TH), zeros at bottom edge
    zrow = jnp.zeros((N, 1, W, C_in), x_nhwc.dtype)
    if num_t > 1:
        top = jnp.concatenate([zrow, x_nhwc[:, TH - 1:H - 1:TH]], axis=1)
        bot = jnp.concatenate([x_nhwc[:, TH:H:TH], zrow], axis=1)
    else:
        top, bot = zrow, zrow
    halo = jnp.stack([top, bot], axis=2).reshape(N, 2 * num_t, W, C_in)

    kernel = _make_kernel(TH, W, C_in, C_mid, C_out, num_t)

    out_nhwc = pl.pallas_call(
        kernel,
        out_shape=jax.ShapeDtypeStruct((N, H, W, C_out), jnp.float32),
        grid=(N, num_t),
        in_specs=[
            pl.BlockSpec((None, TH, W, C_in), lambda n, h: (n, h, 0, 0)),
            pl.BlockSpec((None, 2, W, C_in), lambda n, h: (n, h, 0, 0)),
            pl.BlockSpec((1, 1, C_in), lambda n, h: (0, 0, 0)),
            pl.BlockSpec((1, 1, C_in), lambda n, h: (0, 0, 0)),
            pl.BlockSpec((C_in, C_mid), lambda n, h: (0, 0)),
            pl.BlockSpec((3, 3, C_mid, C_out), lambda n, h: (0, 0, 0, 0)),
        ],
        out_specs=pl.BlockSpec((None, TH, W, C_out), lambda n, h: (n, h, 0, 0)),
        scratch_shapes=[pltpu.VMEM((TH + 2, W + 2, C_mid), jnp.float32)],
        compiler_params=pltpu.CompilerParams(
            dimension_semantics=("parallel", "parallel"),
            vmem_limit_bytes=32 * 1024 * 1024,
        ),
    )(x_nhwc, halo, scale, shift, w1_b, w2_b)

    # TODO(synk): training-mode dropout (drop_rate > 0) not implemented; eval-mode
    # dropout is the identity, which is what is produced here.

    # NHWC -> NCHW and dense concat along channels (glue).
    out_nchw = jnp.transpose(out_nhwc, (0, 3, 1, 2))
    return jnp.concatenate([x_nchw, out_nchw], axis=1)


# ---------------------------------------------------------------------------
# Pure-JAX reference (for correctness check)
# ---------------------------------------------------------------------------
def dense_layer_reference(x_nchw, params, eps=1e-5):
    gamma, beta, run_mean, run_var, w1, w2 = (
        params["gamma"], params["beta"], params["running_mean"],
        params["running_var"], params["w1"], params["w2"])
    scale = gamma / jnp.sqrt(run_var + eps)
    shift = beta - run_mean * scale
    y = x_nchw * scale[None, :, None, None] + shift[None, :, None, None]
    y = jnp.maximum(y, 0.0)
    w1_oihw = jnp.transpose(w1, (1, 0))[:, :, None, None]
    b = jax.lax.conv_general_dilated(y, w1_oihw, (1, 1), 'VALID',
                                     dimension_numbers=('NCHW', 'OIHW', 'NCHW'))
    w2_oihw = jnp.transpose(w2, (3, 2, 0, 1))
    o = jax.lax.conv_general_dilated(b, w2_oihw, (1, 1), ((1, 1), (1, 1)),
                                     dimension_numbers=('NCHW', 'OIHW', 'NCHW'))
    return jnp.concatenate([x_nchw, o], axis=1)


if __name__ == "__main__":
    # DenseLayer(in_channel=4, growth_rate=8, bn_size=4, drop_rate=0)
    N, C_in, H, W = 2, 4, 16, 16
    growth_rate, bn_size = 8, 4
    C_mid = bn_size * growth_rate   # 32
    C_out = growth_rate             # 8

    key = jax.random.PRNGKey(0)
    kx, kg, kb, km, kv, k1, k2 = jax.random.split(key, 7)

    x = jax.random.normal(kx, (N, C_in, H, W), dtype=jnp.float32)
    params = {
        "gamma": jax.random.normal(kg, (C_in,), jnp.float32) * 0.1 + 1.0,
        "beta": jax.random.normal(kb, (C_in,), jnp.float32) * 0.1,
        "running_mean": jax.random.normal(km, (C_in,), jnp.float32) * 0.1,
        "running_var": jax.random.uniform(kv, (C_in,), jnp.float32, 0.5, 1.5),
        # conv1: torch [C_mid, C_in, 1, 1] stored here as [C_in, C_mid]
        "w1": jax.random.normal(k1, (C_in, C_mid), jnp.float32) * 0.1,
        # conv2: torch [C_out, C_mid, 3, 3] stored here as HWIO [3, 3, C_mid, C_out]
        "w2": jax.random.normal(k2, (3, 3, C_mid, C_out), jnp.float32) * 0.1,
    }

    # block_h=8 -> two row tiles per image, exercising the cross-tile halo path.
    out = dense_layer_forward(x, params, drop_rate=0.0, block_h=8)
    out = jax.block_until_ready(out)

    assert out.shape == (N, C_in + growth_rate, H, W), out.shape

    ref = jax.block_until_ready(dense_layer_reference(x, params))

    # The concatenated x channels must be exact.
    if not jnp.array_equal(out[:, :C_in], x):
        raise AssertionError("Pass-through x channels were modified")

    # bf16 matmul inputs with f32 accumulation -> loosened tolerance vs f32 ref.
    if not jnp.allclose(out, ref, atol=2e-2, rtol=2e-2):
        err = float(jnp.max(jnp.abs(out - ref)))
        raise AssertionError(f"Pallas output does not match reference (max abs err {err})")

    print("KERNEL_OK")
</pallas_src>

<mosaic_0001>
module attributes {stable_mosaic.version = 11 : i64} {
  func.func @kernel(%arg0: i32, %arg1: i32, %arg2: memref<1x8x16x4xf32, #tpu.memory_space<vmem>>, %arg3: memref<1x2x16x4xf32, #tpu.memory_space<vmem>>, %arg4: memref<1x1x4xf32, #tpu.memory_space<vmem>>, %arg5: memref<1x1x4xf32, #tpu.memory_space<vmem>>, %arg6: memref<4x32xbf16, #tpu.memory_space<vmem>>, %arg7: memref<3x3x32x8xbf16, #tpu.memory_space<vmem>>, %arg8: memref<1x8x16x8xf32, #tpu.memory_space<vmem>>, %arg9: memref<10x18x32xf32, #tpu.memory_space<vmem>>) attributes {dimension_semantics = [#tpu.dimension_semantics<parallel>, #tpu.dimension_semantics<parallel>], iteration_bounds = array<i64: 2, 2>, scalar_prefetch = 0 : i64, scratch_operands = 1 : i64, tpu.core_type = #tpu.core_type<tc>, window_params = [{transform_indices = @transform_0, window_bounds = array<i64: 1, 8, 16, 4>}, {transform_indices = @transform_1, window_bounds = array<i64: 1, 2, 16, 4>}, {pipeline_mode = #tpu.pipeline_mode<synchronous>, transform_indices = @transform_2, window_bounds = array<i64: 1, 1, 4>}, {pipeline_mode = #tpu.pipeline_mode<synchronous>, transform_indices = @transform_3, window_bounds = array<i64: 1, 1, 4>}, {pipeline_mode = #tpu.pipeline_mode<synchronous>, transform_indices = @transform_4, window_bounds = array<i64: 4, 32>}, {pipeline_mode = #tpu.pipeline_mode<synchronous>, transform_indices = @transform_5, window_bounds = array<i64: 3, 3, 32, 8>}, {transform_indices = @transform_6, window_bounds = array<i64: 1, 8, 16, 8>}]} {
    %c0 = arith.constant 0 : index
    %c0_0 = arith.constant 0 : index
    %c0_1 = arith.constant 0 : index
    %0 = vector.load %arg4[%c0, %c0_0, %c0_1] : memref<1x1x4xf32, #tpu.memory_space<vmem>>, vector<1x1x4xf32>
    %c0_2 = arith.constant 0 : index
    %c0_3 = arith.constant 0 : index
    %c0_4 = arith.constant 0 : index
    %1 = vector.load %arg5[%c0_2, %c0_3, %c0_4] : memref<1x1x4xf32, #tpu.memory_space<vmem>>, vector<1x1x4xf32>
    %c0_5 = arith.constant 0 : index
    %c0_6 = arith.constant 0 : index
    %2 = vector.load %arg6[%c0_5, %c0_6] : memref<4x32xbf16, #tpu.memory_space<vmem>>, vector<4x32xbf16>
    %c0_7 = arith.constant 0 : index
    %c0_8 = arith.constant 0 : index
    %c0_9 = arith.constant 0 : index
    %c0_10 = arith.constant 0 : index
    %3 = vector.load %arg2[%c0_7, %c0_8, %c0_9, %c0_10] : memref<1x8x16x4xf32, #tpu.memory_space<vmem>>, vector<1x8x16x4xf32>
    %4 = vector.shape_cast %3 : vector<1x8x16x4xf32> to vector<8x16x4xf32>
    %5 = vector.broadcast %0 : vector<1x1x4xf32> to vector<8x16x4xf32>
    %6 = arith.mulf %4, %5 : vector<8x16x4xf32>
    %7 = vector.broadcast %1 : vector<1x1x4xf32> to vector<8x16x4xf32>
    %8 = arith.addf %6, %7 : vector<8x16x4xf32>
    %cst = arith.constant 0.000000e+00 : f32
    %9 = vector.broadcast %cst : f32 to vector<8x16x4xf32>
    %10 = arith.maximumf %8, %9 : vector<8x16x4xf32>
    %11 = vector.shape_cast %10 : vector<8x16x4xf32> to vector<128x4xf32>
    %12 = arith.truncf %11 : vector<128x4xf32> to vector<128x4xbf16>
    %cst_11 = arith.constant dense<0.000000e+00> : vector<128x32xf32>
    %13 = tpu.matmul %12, %2, %cst_11 {dimension_numbers = #tpu.dot_dimension_numbers<[1], [0], [0], [1], [0, 0, 1, 1], [], []>} : vector<128x4xbf16>, vector<4x32xbf16>, vector<128x32xf32> -> vector<128x32xf32>
    %14 = vector.shape_cast %13 : vector<128x32xf32> to vector<8x16x32xf32>
    %c1 = arith.constant 1 : index
    %c1_12 = arith.constant 1 : index
    %c0_13 = arith.constant 0 : index
    %15 = vector.load %arg9[%c1, %c1_12, %c0_13] : memref<10x18x32xf32, #tpu.memory_space<vmem>>, vector<8x16x32xf32>
    tpu.vector_store %arg9[%c1, %c1_12, %c0_13], %14 {strides = array<i32>} : memref<10x18x32xf32, #tpu.memory_space<vmem>>, vector<8x16x32xf32>,
    %c0_14 = arith.constant 0 : index
    %c0_15 = arith.constant 0 : index
    %c0_16 = arith.constant 0 : index
    %c0_17 = arith.constant 0 : index
    %16 = vector.load %arg3[%c0_14, %c0_15, %c0_16, %c0_17] : memref<1x2x16x4xf32, #tpu.memory_space<vmem>>, vector<1x2x16x4xf32>
    %17 = vector.shape_cast %16 : vector<1x2x16x4xf32> to vector<2x16x4xf32>
    %18 = vector.broadcast %0 : vector<1x1x4xf32> to vector<2x16x4xf32>
    %19 = arith.mulf %17, %18 : vector<2x16x4xf32>
    %20 = vector.broadcast %1 : vector<1x1x4xf32> to vector<2x16x4xf32>
    %21 = arith.addf %19, %20 : vector<2x16x4xf32>
    %cst_18 = arith.constant 0.000000e+00 : f32
    %22 = vector.broadcast %cst_18 : f32 to vector<2x16x4xf32>
    %23 = arith.maximumf %21, %22 : vector<2x16x4xf32>
    %24 = vector.shape_cast %23 : vector<2x16x4xf32> to vector<32x4xf32>
    %25 = arith.truncf %24 : vector<32x4xf32> to vector<32x4xbf16>
    %cst_19 = arith.constant dense<0.000000e+00> : vector<32x32xf32>
    %26 = tpu.matmul %25, %2, %cst_19 {dimension_numbers = #tpu.dot_dimension_numbers<[1], [0], [0], [1], [0, 0, 1, 1], [], []>} : vector<32x4xbf16>, vector<4x32xbf16>, vector<32x32xf32> -> vector<32x32xf32>
    %27 = vector.shape_cast %26 : vector<32x32xf32> to vector<2x16x32xf32>
    %28 = vector.extract_strided_slice %27 {offsets = [0, 0, 0], sizes = [1, 16, 32], strides = [1, 1, 1]} : vector<2x16x32xf32> to vector<1x16x32xf32>
    %c0_20 = arith.constant 0 : index
    %c1_21 = arith.constant 1 : index
    %c0_22 = arith.constant 0 : index
    %29 = vector.load %arg9[%c0_20, %c1_21, %c0_22] : memref<10x18x32xf32, #tpu.memory_space<vmem>>, vector<1x16x32xf32>
    tpu.vector_store %arg9[%c0_20, %c1_21, %c0_22], %28 {strides = array<i32>} : memref<10x18x32xf32, #tpu.memory_space<vmem>>, vector<1x16x32xf32>,
    %30 = vector.extract_strided_slice %27 {offsets = [1, 0, 0], sizes = [1, 16, 32], strides = [1, 1, 1]} : vector<2x16x32xf32> to vector<1x16x32xf32>
    %c9 = arith.constant 9 : index
    %c1_23 = arith.constant 1 : index
    %c0_24 = arith.constant 0 : index
    %31 = vector.load %arg9[%c9, %c1_23, %c0_24] : memref<10x18x32xf32, #tpu.memory_space<vmem>>, vector<1x16x32xf32>
    tpu.vector_store %arg9[%c9, %c1_23, %c0_24], %30 {strides = array<i32>} : memref<10x18x32xf32, #tpu.memory_space<vmem>>, vector<1x16x32xf32>,
    %cst_25 = arith.constant 0.000000e+00 : f32
    %32 = vector.broadcast %cst_25 : f32 to vector<10x1x32xf32>
    %c0_26 = arith.constant 0 : index
    %c0_27 = arith.constant 0 : index
    %c0_28 = arith.constant 0 : index
    %33 = vector.load %arg9[%c0_26, %c0_27, %c0_28] : memref<10x18x32xf32, #tpu.memory_space<vmem>>, vector<10x1x32xf32>
    tpu.vector_store %arg9[%c0_26, %c0_27, %c0_28], %32 {strides = array<i32>} : memref<10x18x32xf32, #tpu.memory_space<vmem>>, vector<10x1x32xf32>,
    %c0_29 = arith.constant 0 : index
    %c17 = arith.constant 17 : index
    %c0_30 = arith.constant 0 : index
    %34 = vector.load %arg9[%c0_29, %c17, %c0_30] : memref<10x18x32xf32, #tpu.memory_space<vmem>>, vector<10x1x32xf32>
    tpu.vector_store %arg9[%c0_29, %c17, %c0_30], %32 {strides = array<i32>} : memref<10x18x32xf32, #tpu.memory_space<vmem>>, vector<10x1x32xf32>,
    %cst_31 = arith.constant 0.000000e+00 : f32
    %35 = vector.broadcast %cst_31 : f32 to vector<1x18x32xf32>
    %c0_i32 = arith.constant 0 : i32
    %36 = arith.cmpi eq, %arg1, %c0_i32 : i32
    %37 = arith.extui %36 : i1 to i32
    %c0_i32_32 = arith.constant 0 : i32
    %38 = arith.cmpi ne, %37, %c0_i32_32 : i32
    scf.if %38 {
      %c0_110 = arith.constant 0 : index
      %c0_111 = arith.constant 0 : index
      %c0_112 = arith.constant 0 : index
      %110 = vector.load %arg9[%c0_110, %c0_111, %c0_112] : memref<10x18x32xf32, #tpu.memory_space<vmem>>, vector<1x18x32xf32>
      tpu.vector_store %arg9[%c0_110, %c0_111, %c0_112], %35 {strides = array<i32>} : memref<10x18x32xf32, #tpu.memory_space<vmem>>, vector<1x18x32xf32>,
    } else {
    }
    %c1_i32 = arith.constant 1 : i32
    %39 = arith.cmpi eq, %arg1, %c1_i32 : i32
    %40 = arith.extui %39 : i1 to i32
    %c0_i32_33 = arith.constant 0 : i32
    %41 = arith.cmpi ne, %40, %c0_i32_33 : i32
    scf.if %41 {
      %c9_110 = arith.constant 9 : index
      %c0_111 = arith.constant 0 : index
      %c0_112 = arith.constant 0 : index
      %110 = vector.load %arg9[%c9_110, %c0_111, %c0_112] : memref<10x18x32xf32, #tpu.memory_space<vmem>>, vector<1x18x32xf32>
      tpu.vector_store %arg9[%c9_110, %c0_111, %c0_112], %35 {strides = array<i32>} : memref<10x18x32xf32, #tpu.memory_space<vmem>>, vector<1x18x32xf32>,
    } else {
    }
    %cst_34 = arith.constant 0.000000e+00 : f32
    %42 = vector.broadcast %cst_34 : f32 to vector<128x8xf32>
    %c0_35 = arith.constant 0 : index
    %c0_36 = arith.constant 0 : index
    %c0_37 = arith.constant 0 : index
    %43 = vector.load %arg9[%c0_35, %c0_36, %c0_37] : memref<10x18x32xf32, #tpu.memory_space<vmem>>, vector<8x16x32xf32>
    %44 = vector.shape_cast %43 : vector<8x16x32xf32> to vector<128x32xf32>
    %45 = arith.truncf %44 : vector<128x32xf32> to vector<128x32xbf16>
    %c0_38 = arith.constant 0 : index
    %c0_39 = arith.constant 0 : index
    %c0_40 = arith.constant 0 : index
    %c0_41 = arith.constant 0 : index
    %46 = vector.load %arg7[%c0_38, %c0_39, %c0_40, %c0_41] : memref<3x3x32x8xbf16, #tpu.memory_space<vmem>>, vector<1x1x32x8xbf16>
    %47 = vector.shape_cast %46 : vector<1x1x32x8xbf16> to vector<32x8xbf16>
    %cst_42 = arith.constant dense<0.000000e+00> : vector<128x8xf32>
    %48 = tpu.matmul %45, %47, %cst_42 {dimension_numbers = #tpu.dot_dimension_numbers<[1], [0], [0], [1], [0, 0, 1, 1], [], []>} : vector<128x32xbf16>, vector<32x8xbf16>, vector<128x8xf32> -> vector<128x8xf32>
    %49 = arith.addf %42, %48 : vector<128x8xf32>
    %c0_43 = arith.constant 0 : index
    %c1_44 = arith.constant 1 : index
    %c0_45 = arith.constant 0 : index
    %50 = vector.load %arg9[%c0_43, %c1_44, %c0_45] : memref<10x18x32xf32, #tpu.memory_space<vmem>>, vector<8x16x32xf32>
    %51 = vector.shape_cast %50 : vector<8x16x32xf32> to vector<128x32xf32>
    %52 = arith.truncf %51 : vector<128x32xf32> to vector<128x32xbf16>
    %c0_46 = arith.constant 0 : index
    %c1_47 = arith.constant 1 : index
    %c0_48 = arith.constant 0 : index
    %c0_49 = arith.constant 0 : index
    %53 = vector.load %arg7[%c0_46, %c1_47, %c0_48, %c0_49] : memref<3x3x32x8xbf16, #tpu.memory_space<vmem>>, vector<1x1x32x8xbf16>
    %54 = vector.shape_cast %53 : vector<1x1x32x8xbf16> to vector<32x8xbf16>
    %cst_50 = arith.constant dense<0.000000e+00> : vector<128x8xf32>
    %55 = tpu.matmul %52, %54, %cst_50 {dimension_numbers = #tpu.dot_dimension_numbers<[1], [0], [0], [1], [0, 0, 1, 1], [], []>} : vector<128x32xbf16>, vector<32x8xbf16>, vector<128x8xf32> -> vector<128x8xf32>
    %56 = arith.addf %49, %55 : vector<128x8xf32>
    %c0_51 = arith.constant 0 : index
    %c2 = arith.constant 2 : index
    %c0_52 = arith.constant 0 : index
    %57 = vector.load %arg9[%c0_51, %c2, %c0_52] : memref<10x18x32xf32, #tpu.memory_space<vmem>>, vector<8x16x32xf32>
    %58 = vector.shape_cast %57 : vector<8x16x32xf32> to vector<128x32xf32>
    %59 = arith.truncf %58 : vector<128x32xf32> to vector<128x32xbf16>
    %c0_53 = arith.constant 0 : index
    %c2_54 = arith.constant 2 : index
    %c0_55 = arith.constant 0 : index
    %c0_56 = arith.constant 0 : index
    %60 = vector.load %arg7[%c0_53, %c2_54, %c0_55, %c0_56] : memref<3x3x32x8xbf16, #tpu.memory_space<vmem>>, vector<1x1x32x8xbf16>
    %61 = vector.shape_cast %60 : vector<1x1x32x8xbf16> to vector<32x8xbf16>
    %cst_57 = arith.constant dense<0.000000e+00> : vector<128x8xf32>
    %62 = tpu.matmul %59, %61, %cst_57 {dimension_numbers = #tpu.dot_dimension_numbers<[1], [0], [0], [1], [0, 0, 1, 1], [], []>} : vector<128x32xbf16>, vector<32x8xbf16>, vector<128x8xf32> -> vector<128x8xf32>
    %63 = arith.addf %56, %62 : vector<128x8xf32>
    %c1_58 = arith.constant 1 : index
    %c0_59 = arith.constant 0 : index
    %c0_60 = arith.constant 0 : index
    %64 = vector.load %arg9[%c1_58, %c0_59, %c0_60] : memref<10x18x32xf32, #tpu.memory_space<vmem>>, vector<8x16x32xf32>
    %65 = vector.shape_cast %64 : vector<8x16x32xf32> to vector<128x32xf32>
    %66 = arith.truncf %65 : vector<128x32xf32> to vector<128x32xbf16>
    %c1_61 = arith.constant 1 : index
    %c0_62 = arith.constant 0 : index
    %c0_63 = arith.constant 0 : index
    %c0_64 = arith.constant 0 : index
    %67 = vector.load %arg7[%c1_61, %c0_62, %c0_63, %c0_64] : memref<3x3x32x8xbf16, #tpu.memory_space<vmem>>, vector<1x1x32x8xbf16>
    %68 = vector.shape_cast %67 : vector<1x1x32x8xbf16> to vector<32x8xbf16>
    %cst_65 = arith.constant dense<0.000000e+00> : vector<128x8xf32>
    %69 = tpu.matmul %66, %68, %cst_65 {dimension_numbers = #tpu.dot_dimension_numbers<[1], [0], [0], [1], [0, 0, 1, 1], [], []>} : vector<128x32xbf16>, vector<32x8xbf16>, vector<128x8xf32> -> vector<128x8xf32>
    %70 = arith.addf %63, %69 : vector<128x8xf32>
    %c1_66 = arith.constant 1 : index
    %c1_67 = arith.constant 1 : index
    %c0_68 = arith.constant 0 : index
    %71 = vector.load %arg9[%c1_66, %c1_67, %c0_68] : memref<10x18x32xf32, #tpu.memory_space<vmem>>, vector<8x16x32xf32>
    %72 = vector.shape_cast %71 : vector<8x16x32xf32> to vector<128x32xf32>
    %73 = arith.truncf %72 : vector<128x32xf32> to vector<128x32xbf16>
    %c1_69 = arith.constant 1 : index
    %c1_70 = arith.constant 1 : index
    %c0_71 = arith.constant 0 : index
    %c0_72 = arith.constant 0 : index
    %74 = vector.load %arg7[%c1_69, %c1_70, %c0_71, %c0_72] : memref<3x3x32x8xbf16, #tpu.memory_space<vmem>>, vector<1x1x32x8xbf16>
    %75 = vector.shape_cast %74 : vector<1x1x32x8xbf16> to vector<32x8xbf16>
    %cst_73 = arith.constant dense<0.000000e+00> : vector<128x8xf32>
    %76 = tpu.matmul %73, %75, %cst_73 {dimension_numbers = #tpu.dot_dimension_numbers<[1], [0], [0], [1], [0, 0, 1, 1], [], []>} : vector<128x32xbf16>, vector<32x8xbf16>, vector<128x8xf32> -> vector<128x8xf32>
    %77 = arith.addf %70, %76 : vector<128x8xf32>
    %c1_74 = arith.constant 1 : index
    %c2_75 = arith.constant 2 : index
    %c0_76 = arith.constant 0 : index
    %78 = vector.load %arg9[%c1_74, %c2_75, %c0_76] : memref<10x18x32xf32, #tpu.memory_space<vmem>>, vector<8x16x32xf32>
    %79 = vector.shape_cast %78 : vector<8x16x32xf32> to vector<128x32xf32>
    %80 = arith.truncf %79 : vector<128x32xf32> to vector<128x32xbf16>
    %c1_77 = arith.constant 1 : index
    %c2_78 = arith.constant 2 : index
    %c0_79 = arith.constant 0 : index
    %c0_80 = arith.constant 0 : index
    %81 = vector.load %arg7[%c1_77, %c2_78, %c0_79, %c0_80] : memref<3x3x32x8xbf16, #tpu.memory_space<vmem>>, vector<1x1x32x8xbf16>
    %82 = vector.shape_cast %81 : vector<1x1x32x8xbf16> to vector<32x8xbf16>
    %cst_81 = arith.constant dense<0.000000e+00> : vector<128x8xf32>
    %83 = tpu.matmul %80, %82, %cst_81 {dimension_numbers = #tpu.dot_dimension_numbers<[1], [0], [0], [1], [0, 0, 1, 1], [], []>} : vector<128x32xbf16>, vector<32x8xbf16>, vector<128x8xf32> -> vector<128x8xf32>
    %84 = arith.addf %77, %83 : vector<128x8xf32>
    %c2_82 = arith.constant 2 : index
    %c0_83 = arith.constant 0 : index
    %c0_84 = arith.constant 0 : index
    %85 = vector.load %arg9[%c2_82, %c0_83, %c0_84] : memref<10x18x32xf32, #tpu.memory_space<vmem>>, vector<8x16x32xf32>
    %86 = vector.shape_cast %85 : vector<8x16x32xf32> to vector<128x32xf32>
    %87 = arith.truncf %86 : vector<128x32xf32> to vector<128x32xbf16>
    %c2_85 = arith.constant 2 : index
    %c0_86 = arith.constant 0 : index
    %c0_87 = arith.constant 0 : index
    %c0_88 = arith.constant 0 : index
    %88 = vector.load %arg7[%c2_85, %c0_86, %c0_87, %c0_88] : memref<3x3x32x8xbf16, #tpu.memory_space<vmem>>, vector<1x1x32x8xbf16>
    %89 = vector.shape_cast %88 : vector<1x1x32x8xbf16> to vector<32x8xbf16>
    %cst_89 = arith.constant dense<0.000000e+00> : vector<128x8xf32>
    %90 = tpu.matmul %87, %89, %cst_89 {dimension_numbers = #tpu.dot_dimension_numbers<[1], [0], [0], [1], [0, 0, 1, 1], [], []>} : vector<128x32xbf16>, vector<32x8xbf16>, vector<128x8xf32> -> vector<128x8xf32>
    %91 = arith.addf %84, %90 : vector<128x8xf32>
    %c2_90 = arith.constant 2 : index
    %c1_91 = arith.constant 1 : index
    %c0_92 = arith.constant 0 : index
    %92 = vector.load %arg9[%c2_90, %c1_91, %c0_92] : memref<10x18x32xf32, #tpu.memory_space<vmem>>, vector<8x16x32xf32>
    %93 = vector.shape_cast %92 : vector<8x16x32xf32> to vector<128x32xf32>
    %94 = arith.truncf %93 : vector<128x32xf32> to vector<128x32xbf16>
    %c2_93 = arith.constant 2 : index
    %c1_94 = arith.constant 1 : index
    %c0_95 = arith.constant 0 : index
    %c0_96 = arith.constant 0 : index
    %95 = vector.load %arg7[%c2_93, %c1_94, %c0_95, %c0_96] : memref<3x3x32x8xbf16, #tpu.memory_space<vmem>>, vector<1x1x32x8xbf16>
    %96 = vector.shape_cast %95 : vector<1x1x32x8xbf16> to vector<32x8xbf16>
    %cst_97 = arith.constant dense<0.000000e+00> : vector<128x8xf32>
    %97 = tpu.matmul %94, %96, %cst_97 {dimension_numbers = #tpu.dot_dimension_numbers<[1], [0], [0], [1], [0, 0, 1, 1], [], []>} : vector<128x32xbf16>, vector<32x8xbf16>, vector<128x8xf32> -> vector<128x8xf32>
    %98 = arith.addf %91, %97 : vector<128x8xf32>
    %c2_98 = arith.constant 2 : index
    %c2_99 = arith.constant 2 : index
    %c0_100 = arith.constant 0 : index
    %99 = vector.load %arg9[%c2_98, %c2_99, %c0_100] : memref<10x18x32xf32, #tpu.memory_space<vmem>>, vector<8x16x32xf32>
    %100 = vector.shape_cast %99 : vector<8x16x32xf32> to vector<128x32xf32>
    %101 = arith.truncf %100 : vector<128x32xf32> to vector<128x32xbf16>
    %c2_101 = arith.constant 2 : index
    %c2_102 = arith.constant 2 : index
    %c0_103 = arith.constant 0 : index
    %c0_104 = arith.constant 0 : index
    %102 = vector.load %arg7[%c2_101, %c2_102, %c0_103, %c0_104] : memref<3x3x32x8xbf16, #tpu.memory_space<vmem>>, vector<1x1x32x8xbf16>
    %103 = vector.shape_cast %102 : vector<1x1x32x8xbf16> to vector<32x8xbf16>
    %cst_105 = arith.constant dense<0.000000e+00> : vector<128x8xf32>
    %104 = tpu.matmul %101, %103, %cst_105 {dimension_numbers = #tpu.dot_dimension_numbers<[1], [0], [0], [1], [0, 0, 1, 1], [], []>} : vector<128x32xbf16>, vector<32x8xbf16>, vector<128x8xf32> -> vector<128x8xf32>
    %105 = arith.addf %98, %104 : vector<128x8xf32>
    %106 = vector.shape_cast %105 : vector<128x8xf32> to vector<8x16x8xf32>
    %c0_106 = arith.constant 0 : index
    %c0_107 = arith.constant 0 : index
    %c0_108 = arith.constant 0 : index
    %c0_109 = arith.constant 0 : index
    %107 = vector.load %arg8[%c0_106, %c0_107, %c0_108, %c0_109] : memref<1x8x16x8xf32, #tpu.memory_space<vmem>>, vector<1x8x16x8xf32>
    %108 = vector.shape_cast %107 : vector<1x8x16x8xf32> to vector<8x16x8xf32>
    %109 = vector.shape_cast %106 : vector<8x16x8xf32> to vector<1x8x16x8xf32>
    tpu.vector_store %arg8[%c0_106, %c0_107, %c0_108, %c0_109], %109 {strides = array<i32>} : memref<1x8x16x8xf32, #tpu.memory_space<vmem>>, vector<1x8x16x8xf32>,
    return
  }
  func.func @transform_0(%arg0: i32, %arg1: i32) -> (i32, i32, i32, i32) {
    %c0_i32 = arith.constant 0 : i32
    %c0_i32_0 = arith.constant 0 : i32
    %c0_i32_1 = arith.constant 0 : i32
    return %arg0, %arg1, %c0_i32, %c0_i32_0 : i32, i32, i32, i32
  }
  func.func @transform_1(%arg0: i32, %arg1: i32) -> (i32, i32, i32, i32) {
    %c0_i32 = arith.constant 0 : i32
    %c0_i32_0 = arith.constant 0 : i32
    %c0_i32_1 = arith.constant 0 : i32
    return %arg0, %arg1, %c0_i32, %c0_i32_0 : i32, i32, i32, i32
  }
  func.func @transform_2(%arg0: i32, %arg1: i32) -> (i32, i32, i32) {
    %c0_i32 = arith.constant 0 : i32
    %c0_i32_0 = arith.constant 0 : i32
    %c0_i32_1 = arith.constant 0 : i32
    %c0_i32_2 = arith.constant 0 : i32
    return %c0_i32, %c0_i32_0, %c0_i32_1 : i32, i32, i32
  }
  func.func @transform_3(%arg0: i32, %arg1: i32) -> (i32, i32, i32) {
    %c0_i32 = arith.constant 0 : i32
    %c0_i32_0 = arith.constant 0 : i32
    %c0_i32_1 = arith.constant 0 : i32
    %c0_i32_2 = arith.constant 0 : i32
    return %c0_i32, %c0_i32_0, %c0_i32_1 : i32, i32, i32
  }
  func.func @transform_4(%arg0: i32, %arg1: i32) -> (i32, i32) {
    %c0_i32 = arith.constant 0 : i32
    %c0_i32_0 = arith.constant 0 : i32
    %c0_i32_1 = arith.constant 0 : i32
    return %c0_i32, %c0_i32_0 : i32, i32
  }
  func.func @transform_5(%arg0: i32, %arg1: i32) -> (i32, i32, i32, i32) {
    %c0_i32 = arith.constant 0 : i32
    %c0_i32_0 = arith.constant 0 : i32
    %c0_i32_1 = arith.constant 0 : i32
    %c0_i32_2 = arith.constant 0 : i32
    %c0_i32_3 = arith.constant 0 : i32
    return %c0_i32, %c0_i32_0, %c0_i32_1, %c0_i32_2 : i32, i32, i32, i32
  }
  func.func @transform_6(%arg0: i32, %arg1: i32) -> (i32, i32, i32, i32) {
    %c0_i32 = arith.constant 0 : i32
    %c0_i32_0 = arith.constant 0 : i32
    %c0_i32_1 = arith.constant 0 : i32
    return %arg0, %arg1, %c0_i32, %c0_i32_0 : i32, i32, i32, i32
  }
}

</mosaic_0001>

<bundles_post_ra>
// kernel: tpu_custom_call.1
= control target key start
LH: loop header
LB: loop body
LE: loop exit
PB: predicated region body
PF: predicated region fallthrough
CT: control target
= control target key end

     0   :  { %s3119_s21 = smov 0   ;;  %s3121_s22 = smov 0   ;;  %s3569_s0 = inlined_call_operand.vmem [shape: f32[2,16,16,4], index: 0, kind: input, shape index: {}]   ;;  %s3570_s1 = inlined_call_operand.vmem [shape: f32[2,4,16,4], index: 1, kind: input, shape index: {}]   ;;  %s3571_s2 = inlined_call_operand.vmem [shape: f32[1,1,4], index: 2, kind: input, shape index: {}]   ;;  %s3572_s3 = inlined_call_operand.vmem [shape: f32[1,1,4], index: 3, kind: input, shape index: {}]   ;;  %s3573_s4 = inlined_call_operand.vmem [shape: bf16[4,32], index: 4, kind: input, shape index: {}]   ;;  %s3574_s5 = inlined_call_operand.vmem [shape: bf16[3,3,32,8], index: 5, kind: input, shape index: {}]   ;;  %s3575_s6 = inlined_call_operand.vmem [shape: f32[2,16,16,8], index: 6, kind: output, shape index: {}]  }
   0x1   :  { %s3123_s23 = smov 0   ;;  %s3125_s24 = smov 0  }
   0x2   :  { %s3127_s25 = smov 0  }
   0x3 LB: > { %s25_s26 = sadd.s32 1, %s3071_s23  ;;  %s28_s27 = sadd.s32 1, %s3075_s24  ;;  %s3079_s25 = sphi %s3127_s25, %s16_s25   ;;  %s3075_s24 = sphi %s3125_s24, %s3579_s24   ;;  %s3071_s23 = sphi %s3123_s23, %s3578_s23   ;;  %s3067_s22 = sphi %s3121_s22, %s3577_s22   ;;  %s3063_s21 = sphi %s3119_s21, %s3576_s21  }
   0x4   : > { %p26_p0 = scmp.ge.s32.totalorder %s25_s26, 2  ;;  %p2393_p1 = scmp.ge.s32.totalorder %s3079_s25, 1 }
   0x5   : > { %p252_p2 = scmp.lt.s32.totalorder %s3079_s25, 5 }
   0x6   : > { %s3581_s26 = smov (%p26_p0, %s25_s26), 0  ;;  %s3583_s27 = smov (!%p26_p0, %s28_s27), %s3075_s24 }
   0x7   : > { %p253_p3 = pnand %p2393_p1, %p252_p2  ;;  %p30_p4 = scmp.ge.s32.totalorder %s3583_s27, 2 }
   0x8   : > { %v338_v0 = vld [vmem:[%s3573_s4] sm:$0x3] (!%p253_p3)  ;;  %vm448_vm0 = vcmask (!%p253_p3), 1041408   ;;  %s2394_s30 = sshll.u32 (!%p253_p3), %s3063_s21, 3  ;;  %p303_p5 = scmp.lt.s32.totalorder (!%p253_p3), %s3067_s22, 1  ;;  %vm423_vm1 = vcmask (!%p253_p3), 31744  }
   0x9   : > { %s3585_s27 = smov (%p30_p4, %s3583_s27), 0  ;;  %256 = sbr.rel (%p253_p3) target bundleno = 660 (0x294), region = 44 }
   0xa   : > { %2978 = vmatprep.subr.msk.bf16.mxu0 (!%p253_p3), %vm448_vm0, %v338_v0  ;;  %v450_v1 = vsel (!%p253_p3), %vm448_vm0, %v338_v0, 0  ;;  %p305_p6 = scmp.lt.s32.totalorder (!%p253_p3), %s2394_s30, 15  ;;  %2979 = vmatprep.subr.msk.bf16.mxu1 (!%p253_p3), %vm448_vm0, %v338_v0  ;;  %s2398_s8 = sshll.u32 (!%p253_p3), %s3063_s21, 1  ;;  %v3162_v2 = vld [vmem:[%s3571_s2] ss:$0 sm:$0xff] (!%p253_p3)  ;;  %vm645_vm2 = vcmask (!%p253_p3), 253952  }
   0xb   : > { %2647 = vmatpush3.bf16.msra.mxu0 (!%p253_p3), %v450_v1  ;;  %2665 = vmatpush3.bf16.msra.mxu1 (!%p253_p3), %v450_v1  ;;  %p316_p7 = scmp.lt.s32.totalorder (!%p253_p3), %s2398_s8, 3  ;;  %v3178_v3 = vld [vmem:[%s3572_s3] ss:$0 sm:$0xff] (!%p253_p3)  ;;  %vm550_vm3 = vcmask (!%p253_p3), 261120   ;;  %p2418_p8 = scmp.ne.s32.totalorder (!%p253_p3), %s3063_s21, 0 }
  0x10   : > { %s3587_s22 = smov (!%p303_p5, %s3067_s22), 1  ;;  %s3589_s30 = smov (!%p305_p6, %s2394_s30), 15 }
  0x11   : > { %s2396_s7 = sshll.u32 %s3587_s22, 5  ;;  %s2395_s9 = sshll.u32 %s3589_s30, 1  ;;  %vm672_vm4 = vcmask (!%p2418_p8), 254976  }
  0x12   : > { %s309_s10 = sadd.s32 %s2396_s7, %s2395_s9  ;;  %s2400_s14 = sshll.u32 %s3587_s22, 3 }
  0x13   : > { %s2397_s11 = sshll.u32 %s309_s10, 3  ;;  %s3591_s8 = smov (!%p316_p7, %s2398_s8), 3 }
  0x14   : > { %s3168_s17 = scalar_lea.vmem %s3569_s0, %s2397_s11  ;;  %s3173_s20 = scalar_lea.vmem %s3575_s6, %s2397_s11 }
  0x15   : > { %v339_v4 = vld [vmem:[%s3168_s17] sm:$0xff]  ;;  %v340_v5 = vld [vmem:[%s3168_s17 + $0x8] sm:$0xff]  ;;  %v341_v6 = vld [vmem:[%s3168_s17 + $0x10] sm:$0xff]  ;;  %s2399_s22 = sshll.u32 %s3591_s8, 1 }
  0x16   : > { %v361_v7 = vmul.f32 %v3162_v2, %v339_v4  ;;  %v362_v8 = vmul.f32 %v3162_v2, %v340_v5  ;;  %v342_v9 = vld [vmem:[%s3168_s17 + $0x18] sm:$0xff]  ;;  %v363_v10 = vmul.f32 %v3162_v2, %v341_v6  ;;  %v343_v11 = vld [vmem:[%s3168_s17 + $0x20] sm:$0xff]  ;;  %v344_v12 = vld [vmem:[%s3168_s17 + $0x28] sm:$0xff]  ;;  %s320_s30 = sadd.s32 %s2400_s14, %s2399_s22 }
  0x17   : > { %v364_v13 = vmul.f32 %v3162_v2, %v342_v9  ;;  %v365_v14 = vmul.f32 %v3162_v2, %v343_v11  ;;  %v366_v15 = vmul.f32 %v3162_v2, %v344_v12  ;;  %v345_v16 = vld [vmem:[%s3168_s17 + $0x30] sm:$0xff]  ;;  %v346_v17 = vld [vmem:[%s3168_s17 + $0x38] sm:$0xff]  ;;  %v347_v26 = vld [vmem:[%s3168_s17 + $0x40] sm:$0xff]  ;;  %s2401_s7 = sshll.u32 %s320_s30, 3 }
  0x18   : > { %v383_v18 = vadd.f32 %v3178_v3, %v361_v7  ;;  %v384_v19 = vadd.f32 %v3178_v3, %v362_v8  ;;  %v385_v20 = vadd.f32 %v3178_v3, %v363_v10  ;;  %v367_v21 = vmul.f32 %v3162_v2, %v345_v16  ;;  %v348_v27 = vld [vmem:[%s3168_s17 + $0x48] sm:$0xff]  ;;  %v349_v32 = vld [vmem:[%s3168_s17 + $0x50] sm:$0xff]  ;;  %s322_s10 = scalar_lea.vmem %s3570_s1, %s2401_s7  ;;  %v350_v37 = vld [vmem:[%s3168_s17 + $0x58] sm:$0xff] }
  0x19   : > { %v386_v22 = vadd.f32 %v3178_v3, %v364_v13  ;;  %v387_v23 = vadd.f32 %v3178_v3, %v365_v14  ;;  %v388_v24 = vadd.f32 %v3178_v3, %v366_v15  ;;  %v368_v25 = vmul.f32 %v3162_v2, %v346_v17  ;;  %v567_v38 = vld [vmem:[%s322_s10] sm:$0xff]  ;;  %v568_v43 = vld [vmem:[%s322_s10 + $0x8] sm:$0xff]  ;;  %v569_v44 = vld [vmem:[%s322_s10 + $0x10] sm:$0xff] }
  0x1a   : > { %v399_v28 = vmax.f32 %v383_v18, 0.0  ;;  %v400_v29 = vmax.f32 %v384_v19, 0.0  ;;  %v401_v30 = vmax.f32 %v385_v20, 0.0  ;;  %v389_v31 = vadd.f32 %v3178_v3, %v367_v21  ;;  %v570_v53 = vld [vmem:[%s322_s10 + $0x18] sm:$0xff]  ;;  %v351_v56 = vld [vmem:[%s3168_s17 + $0x60] sm:$0xff]  ;;  %v352_v60 = vld [vmem:[%s3168_s17 + $0x68] sm:$0xff] }
  0x1b   : > { %v402_v33 = vmax.f32 %v386_v22, 0.0  ;;  %v403_v34 = vmax.f32 %v387_v23, 0.0  ;;  %v404_v35 = vmax.f32 %v388_v24, 0.0  ;;  %v390_v36 = vadd.f32 %v3178_v3, %v368_v25  ;;  %v353_v13 = vld [vmem:[%s3168_s17 + $0x70] sm:$0xff]  ;;  %v354_v14 = vld [vmem:[%s3168_s17 + $0x78] sm:$0xff] }
  0x1c   : > { %v415_v39 = vpack.c.bf16 %v400_v29, %v399_v28  ;;  %v405_v40 = vmax.f32 %v389_v31, 0.0  ;;  %v369_v41 = vmul.f32 %v3162_v2, %v347_v26  ;;  %v370_v42 = vmul.f32 %v3162_v2, %v348_v27 }
  0x1d   : > { %v416_v45 = vpack.c.bf16 %v402_v33, %v401_v30  ;;  %v417_v46 = vpack.c.bf16 %v404_v35, %v403_v34  ;;  %v406_v47 = vmax.f32 %v390_v36, 0.0  ;;  %v371_v48 = vmul.f32 %v3162_v2, %v349_v32 }
  0x1e   : > { %2648 = vmatprep.mubr.msk.bf16.mxu0 %vm423_vm1, %v415_v39  ;;  %v391_v49 = vadd.f32 %v3178_v3, %v369_v41  ;;  %v392_v50 = vadd.f32 %v3178_v3, %v370_v42  ;;  %v372_v51 = vmul.f32 %v3162_v2, %v350_v37  ;;  %v571_v52 = vmul.f32 %v3162_v2, %v567_v38 }
  0x1f   : > { %2649 = vmatmul.mubr.msk.bf16.vlgmr.msra.gmra.mrb[0].mxu0 %vm423_vm1, %v416_v45  ;;  %v572_v54 = vmul.f32 %v3162_v2, %v568_v43  ;;  %v573_v55 = vmul.f32 %v3162_v2, %v569_v44  ;;  %v418_v61 = vpack.c.bf16 %v406_v47, %v405_v40  ;;  %v574_v63 = vmul.f32 %v3162_v2, %v570_v53 }
  0x20   : > { %2652 = vmatprep.mubr.msk.bf16.mxu0 %vm423_vm1, %v417_v46  ;;  %v407_v57 = vmax.f32 %v391_v49, 0.0  ;;  %v408_v58 = vmax.f32 %v392_v50, 0.0  ;;  %v575_v59 = vadd.f32 %v3178_v3, %v571_v52  ;;  %v393_v1 = vadd.f32 %v3178_v3, %v371_v48 }
  0x21   : > { %v576_v62 = vadd.f32 %v3178_v3, %v572_v54  ;;  %v577_v0 = vadd.f32 %v3178_v3, %v573_v55  ;;  %v394_v4 = vadd.f32 %v3178_v3, %v372_v51  ;;  %v373_v6 = vmul.f32 %v3162_v2, %v351_v56 }
  0x22   : > { %v579_v5 = vmax.f32 %v575_v59, 0.0  ;;  %v578_v8 = vadd.f32 %v3178_v3, %v574_v63  ;;  %v374_v10 = vmul.f32 %v3162_v2, %v352_v60  ;;  %v419_v11 = vpack.c.bf16 %v408_v58, %v407_v57 }
  0x23   : > { %v580_v7 = vmax.f32 %v576_v62, 0.0  ;;  %v581_v9 = vmax.f32 %v577_v0, 0.0  ;;  %v395_v12 = vadd.f32 %v3178_v3, %v373_v6  ;;  %v409_v18 = vmax.f32 %v393_v1, 0.0 }
  0x24   : > { %v582_v16 = vmax.f32 %v578_v8, 0.0  ;;  %v396_v17 = vadd.f32 %v3178_v3, %v374_v10  ;;  %v410_v19 = vmax.f32 %v394_v4, 0.0  ;;  %v375_v21 = vmul.f32 %v3162_v2, %v353_v13 }
  0x25   : > { %v583_v15 = vpack.c.bf16 %v580_v7, %v579_v5  ;;  %v376_v22 = vmul.f32 %v3162_v2, %v354_v14  ;;  %v411_v23 = vmax.f32 %v395_v12, 0.0  ;;  %v3081_v2 = vmov 0.0  }
  0x26   : > { %v584_v20 = vpack.c.bf16 %v582_v16, %v581_v9  ;;  %v412_v24 = vmax.f32 %v396_v17, 0.0  ;;  %v420_v25 = vpack.c.bf16 %v410_v19, %v409_v18  ;;  %v397_v26 = vadd.f32 %v3178_v3, %v375_v21  ;;  %646 = vst.msk [vmem:[#allocation2] sm:$0x1] %vm645_vm2, %v3081_v2  ;;  %647 = vst.msk [vmem:[#allocation2 + $0x18] sm:$0x1] %vm645_vm2, %v3081_v2 }
  0x27   : > { %2653 = vmatmul.mubr.msk.bf16.gmra.mrb[4].mxu0 %vm423_vm1, %v418_v61  ;;  %2666 = vmatprep.mubr.msk.bf16.mxu1 %vm423_vm1, %v583_v15  ;;  %v398_v27 = vadd.f32 %v3178_v3, %v376_v22  ;;  %648 = vst.msk [vmem:[#allocation2 + $0x30] sm:$0x1] %vm645_vm2, %v3081_v2  ;;  %649 = vst.msk [vmem:[#allocation2 + $0x48] sm:$0x1] %vm645_vm2, %v3081_v2  ;;  %v3082_v51 = vmov (!%p2418_p8), 0.0  }
  0x28   : > { %2656 = vmatprep.mubr.msk.bf16.mxu0 %vm423_vm1, %v419_v11  ;;  %2667 = vmatmul.mubr.msk.bf16.vlgmr.msra.gmra.mrb[0].mxu1 %vm423_vm1, %v584_v20  ;;  %v421_v28 = vpack.c.bf16 %v412_v24, %v411_v23  ;;  %v413_v29 = vmax.f32 %v397_v26, 0.0  ;;  %650 = vst.msk [vmem:[#allocation2 + $0x60] sm:$0x1] %vm645_vm2, %v3081_v2  ;;  %651 = vst.msk [vmem:[#allocation2 + $0x78] sm:$0x1] %vm645_vm2, %v3081_v2 }
  0x29   : > { %v414_v30 = vmax.f32 %v398_v27, 0.0  ;;  %652 = vst.msk [vmem:[#allocation2 + $0x90] sm:$0x1] %vm645_vm2, %v3081_v2  ;;  %653 = vst.msk [vmem:[#allocation2 + $0xa8] sm:$0x1] %vm645_vm2, %v3081_v2 }
  0x2a   : > { %654 = vst.msk [vmem:[#allocation2 + $0xc0] sm:$0x1] %vm645_vm2, %v3081_v2  ;;  %655 = vst.msk [vmem:[#allocation2 + $0xd8] sm:$0x1] %vm645_vm2, %v3081_v2 }
  0x2b   : > { %v422_v31 = vpack.c.bf16 %v414_v30, %v413_v29  ;;  %656 = vst.msk [vmem:[#allocation2 + $0x11] sm:$0x1] %vm645_vm2, %v3081_v2  ;;  %657 = vst.msk [vmem:[#allocation2 + $0x29] sm:$0x1] %vm645_vm2, %v3081_v2 }
  0x2c   : > { %658 = vst.msk [vmem:[#allocation2 + $0x41] sm:$0x1] %vm645_vm2, %v3081_v2  ;;  %659 = vst.msk [vmem:[#allocation2 + $0x59] sm:$0x1] %vm645_vm2, %v3081_v2 }
  0x2d   : > { %660 = vst.msk [vmem:[#allocation2 + $0x71] sm:$0x1] %vm645_vm2, %v3081_v2  ;;  %661 = vst.msk [vmem:[#allocation2 + $0x89] sm:$0x1] %vm645_vm2, %v3081_v2 }
  0x2e   : > { %662 = vst.msk [vmem:[#allocation2 + $0xa1] sm:$0x1] %vm645_vm2, %v3081_v2  ;;  %663 = vst.msk [vmem:[#allocation2 + $0xb9] sm:$0x1] %vm645_vm2, %v3081_v2 }
  0x2f   : > { %2657 = vmatmul.mubr.msk.bf16.gmra.mrb[8].mxu0 %vm423_vm1, %v420_v25  ;;  %664 = vst.msk [vmem:[#allocation2 + $0xd1] sm:$0x1] %vm645_vm2, %v3081_v2  ;;  %665 = vst.msk [vmem:[#allocation2 + $0xe9] sm:$0x1] %vm645_vm2, %v3081_v2 }
  0x30   : > { %2660 = vmatprep.mubr.msk.bf16.mxu0 %vm423_vm1, %v421_v28 }
  0x37   : > { %2661 = vmatmul.mubr.msk.bf16.gmra.mrb[12].mxu0 %vm423_vm1, %v422_v31 }
  0xf2   : > { %v2650_v3 = vpop.f32.mrb[0].mxu0 }
  0xf3   : > { %553 = vst.msk [vmem:[#allocation2 + $0x31] sm:$0xff] %vm550_vm3, %v2650_v3  ;;  %v486_v32 = vpop.f32.mrb[1].mxu0 }
  0xf4   : > { %551 = vst.msk [vmem:[#allocation2 + $0x19] sm:$0xff] %vm550_vm3, %v486_v32  ;;  %v2651_v33 = vpop.f32.mrb[2].mxu0 }
  0xf5   : > { %554 = vst.msk [vmem:[#allocation2 + $0x39] sm:$0xff] %vm550_vm3, %v2651_v33  ;;  %v489_v34 = vpop.f32.mrb[3].mxu0 }
  0xf6   : > { %552 = vst.msk [vmem:[#allocation2 + $0x21] sm:$0xff] %vm550_vm3, %v489_v34 }
  0xfa   : > { %v2654_v35 = vpop.f32.mrb[4].mxu0 }
  0xfb   : > { %557 = vst.msk [vmem:[#allocation2 + $0x61] sm:$0xff] %vm550_vm3, %v2654_v35  ;;  %v502_v36 = vpop.f32.mrb[5].mxu0  ;;  %v2668_v38 = vpop.f32.mrb[0].mxu1 }
  0xfc   : > { %555 = vst.msk [vmem:[#allocation2 + $0x49] sm:$0xff] %vm550_vm3, %v502_v36  ;;  %v2655_v37 = vpop.f32.mrb[6].mxu0  ;;  %643 = vst.msk [vmem:[#allocation2 + $0xd9] sm:$0xff] %vm550_vm3, %v2668_v38  ;;  %v625_v40 = vpop.f32.mrb[1].mxu1 }
  0xfd   : > { %558 = vst.msk [vmem:[#allocation2 + $0x69] sm:$0xff] %vm550_vm3, %v2655_v37  ;;  %v505_v39 = vpop.f32.mrb[7].mxu0  ;;  %640 = vst.msk [vmem:[#allocation2 + $0x1] sm:$0xff] %vm550_vm3, %v625_v40  ;;  %v2669_v41 = vpop.f32.mrb[2].mxu1 }
  0xfe   : > { %556 = vst.msk [vmem:[#allocation2 + $0x51] sm:$0xff] %vm550_vm3, %v505_v39  ;;  %644 = vst.msk [vmem:[#allocation2 + $0xe1] sm:$0xff] %vm550_vm3, %v2669_v41  ;;  %v628_v42 = vpop.f32.mrb[3].mxu1 }
  0xff   : > { %641 = vst.msk [vmem:[#allocation2 + $0x9] sm:$0xff] %vm550_vm3, %v628_v42  ;;  %670 = vst.msk [vmem:[#allocation2] sm:$0xff] (!%p2418_p8), %vm550_vm3, %v3082_v51 }
 0x100   : > { %671 = vst.msk [vmem:[#allocation2 + $0x8] sm:$0xff] (!%p2418_p8), %vm550_vm3, %v3082_v51 }
 0x101   : > { %673 = vst.msk [vmem:[#allocation2 + $0x10] sm:$0x3] (!%p2418_p8), %vm672_vm4, %v3082_v51 }
 0x102   : > { %v2658_v43 = vpop.f32.mrb[8].mxu0 }
 0x103   : > { %561 = vst.msk [vmem:[#allocation2 + $0x91] sm:$0xff] %vm550_vm3, %v2658_v43  ;;  %v518_v44 = vpop.f32.mrb[9].mxu0 }
 0x104   : > { %559 = vst.msk [vmem:[#allocation2 + $0x79] sm:$0xff] %vm550_vm3, %v518_v44  ;;  %v2659_v45 = vpop.f32.mrb[10].mxu0 }
 0x105   : > { %562 = vst.msk [vmem:[#allocation2 + $0x99] sm:$0xff] %vm550_vm3, %v2659_v45  ;;  %v521_v46 = vpop.f32.mrb[11].mxu0 }
 0x106   : > { %560 = vst.msk [vmem:[#allocation2 + $0x81] sm:$0xff] %vm550_vm3, %v521_v46 }
 0x108   : > { %669 = sbr.rel (%p2418_p8) target bundleno = 271 (0x10f), region = 48 }
 0x10a   : > { %v2662_v47 = vpop.f32.mrb[12].mxu0 }
 0x10b   : > { %565 = vst.msk [vmem:[#allocation2 + $0xc1] sm:$0xff] %vm550_vm3, %v2662_v47  ;;  %v534_v48 = vpop.f32.mrb[13].mxu0 }
 0x10c   : > { %563 = vst.msk [vmem:[#allocation2 + $0xa9] sm:$0xff] %vm550_vm3, %v534_v48  ;;  %v2663_v49 = vpop.f32.mrb[14].mxu0 }
 0x10d   : > { %566 = vst.msk [vmem:[#allocation2 + $0xc9] sm:$0xff] %vm550_vm3, %v2663_v49  ;;  %v537_v50 = vpop.f32.mrb[15].mxu0 }
 0x10e   : > { %564 = vst.msk [vmem:[#allocation2 + $0xb1] sm:$0xff] %vm550_vm3, %v537_v50 }
 0x10f PF: > { %p2419_p9 = scmp.ne.s32.totalorder %s3063_s21, 1 }
 0x110   : > { %vm680_vm5 = vcmask (!%p2419_p9), 254976   ;;  %v3083_v52 = vmov (!%p2419_p9), 0.0  }
 0x111   : > { %677 = sbr.rel (%p2419_p9) target bundleno = 280 (0x118), region = 52  ;;  %678 = vst.msk [vmem:[#allocation2 + $0xd8] sm:$0xff] (!%p2419_p9), %vm550_vm3, %v3083_v52  ;;  %679 = vst.msk [vmem:[#allocation2 + $0xe0] sm:$0xff] (!%p2419_p9), %vm550_vm3, %v3083_v52 }
 0x112   : > { %681 = vst.msk [vmem:[#allocation2 + $0xe8] sm:$0x3] (!%p2419_p9), %vm680_vm5, %v3083_v52 }
 0x118 PF: > { %v3023_v53 = vld [vmem:[%s3574_s5 + $0x10] sm:$0xff]   ;;  %v3024_v54 = vld [vmem:[%s3574_s5 + $0x40] sm:$0xff]   ;;  %v3025_v55 = vld [vmem:[%s3574_s5 + $0x18] sm:$0xff]   ;;  %vm2252_vm6 = vcmask 64512  }
 0x119   : > { %2670 = vmatprep.subr.bf16.mxu0 %v3023_v53  ;;  %2750 = vmatprep.subr.bf16.mxu1 %v3024_v54  ;;  %v3026_v56 = vld [vmem:[%s3574_s5 + $0x48] sm:$0xff]   ;;  %v1361_v59 = vld [vmem:[#allocation2 + $0x19] sm:$0xff]  ;;  %v1363_v62 = vld [vmem:[#allocation2 + $0x31] sm:$0xff] }
 0x11a   : > { %2671 = vmatpush3.bf16.msra.mxu0 %v3023_v53  ;;  %2751 = vmatpush3.bf16.msra.mxu1 %v3024_v54  ;;  %v710_v57 = vld [vmem:[#allocation2 + $0x1] sm:$0xff]  ;;  %v711_v58 = vld [vmem:[#allocation2 + $0x9] sm:$0xff]  ;;  %v1364_v63 = vld [vmem:[#allocation2 + $0x39] sm:$0xff] }
 0x11b   : > { %2672 = vmatprep.subr.bf16.mxu0 %v3025_v55  ;;  %2752 = vmatprep.subr.bf16.mxu1 %v3026_v56  ;;  %v726_v60 = vpack.c.bf16 %v711_v58, %v710_v57  ;;  %v1362_v61 = vld [vmem:[#allocation2 + $0x21] sm:$0xff]  ;;  %v3027_v1 = vld [vmem:[%s3574_s5 + $0x50] sm:$0xff]   ;;  %v3311_v4 = vpack.c.bf16 %v1364_v63, %v1363_v62  ;;  %v3028_v9 = vld [vmem:[%s3574_s5 + $0x58] sm:$0xff]  }
 0x11c   : > { %v1377_v0 = vpack.c.bf16 %v1362_v61, %v1361_v59  ;;  %v1365_v5 = vld [vmem:[#allocation2 + $0x49] sm:$0xff]  ;;  %v1366_v6 = vld [vmem:[#allocation2 + $0x51] sm:$0xff]  ;;  %v1367_v8 = vld [vmem:[#allocation2 + $0x61] sm:$0xff] }
 0x11d   : > { %2674 = vmatprep.mubr.msk.bf16.mxu0 %vm550_vm3, %v726_v60  ;;  %v3314_v7 = vpack.c.bf16 %v1366_v6, %v1365_v5  ;;  %v1368_v10 = vld [vmem:[#allocation2 + $0x69] sm:$0xff]  ;;  %v1369_v11 = vld [vmem:[#allocation2 + $0x79] sm:$0xff]  ;;  %v1370_v12 = vld [vmem:[#allocation2 + $0x81] sm:$0xff] }
 0x11e   : > { %2673 = vmatpush3.bf16.msra.mxu0 %v3025_v55  ;;  %2753 = vmatpush3.bf16.msra.mxu1 %v3026_v56  ;;  %v3029_v13 = vld [vmem:[%s3574_s5] sm:$0xff]   ;;  %v3030_v14 = vld [vmem:[%s3574_s5 + $0x8] sm:$0xff]   ;;  %v3332_v15 = vpack.c.bf16 %v1368_v10, %v1367_v8  ;;  %v3334_v16 = vpack.c.bf16 %v1370_v12, %v1369_v11  ;;  %v1371_v18 = vld [vmem:[#allocation2 + $0x91] sm:$0xff] }
 0x11f   : > { %2754 = vmatprep.mubr.msk.bf16.mxu1 %vm550_vm3, %v1377_v0  ;;  %2770 = vmatprep.subr.bf16.mxu1 %v3027_v1  ;;  %v3031_v17 = vld [vmem:[%s3574_s5 + $0x60] sm:$0xff]   ;;  %v1373_v20 = vld [vmem:[#allocation2 + $0xa9] sm:$0xff]  ;;  %v1374_v21 = vld [vmem:[#allocation2 + $0xb1] sm:$0xff] }
 0x120   : > { %2690 = vmatprep.subr.bf16.mxu0 %v3029_v13  ;;  %v1372_v19 = vld [vmem:[#allocation2 + $0x99] sm:$0xff]  ;;  %v3349_v23 = vpack.c.bf16 %v1374_v21, %v1373_v20  ;;  %v1375_v24 = vld [vmem:[#allocation2 + $0xc1] sm:$0xff]  ;;  %v1376_v26 = vld [vmem:[#allocation2 + $0xc9] sm:$0xff] }
 0x121   : > { %2675 = vmatmul.mubr.msk.bf16.vlgmr.msra.gmra.mrb[16].mxu0 %vm550_vm3, %v1377_v0  ;;  %2755 = vmatmul.mubr.msk.bf16.vlgmr.msra.gmra.mrb[4].mxu1 %vm550_vm3, %v3311_v4  ;;  %v3347_v22 = vpack.c.bf16 %v1372_v19, %v1371_v18  ;;  %v3033_v25 = vld [vmem:[%s3574_s5 + $0x20] sm:$0xff]   ;;  %v683_v28 = vld [vmem:[#allocation2 + $0x8] sm:$0xff]  ;;  %v3362_v31 = vpack.c.bf16 %v1376_v26, %v1375_v24  ;;  %v684_v32 = vld [vmem:[#allocation2 + $0x18] sm:$0xff] }
 0x122   : > { %2678 = vmatprep.mubr.msk.bf16.mxu0 %vm550_vm3, %v3311_v4  ;;  %2771 = vmatpush3.bf16.msra.mxu1 %v3027_v1  ;;  %v682_v27 = vld [vmem:[#allocation2] sm:$0xff]  ;;  %v1541_v34 = vld [vmem:[#allocation2 + $0x32] sm:$0xff]  ;;  %v1543_v38 = vld [vmem:[#allocation2 + $0x4a] sm:$0xff] }
 0x123   : > { %2758 = vmatprep.mubr.msk.bf16.mxu1 %vm550_vm3, %v3314_v7  ;;  %2772 = vmatprep.subr.bf16.mxu1 %v3028_v9  ;;  %v1539_v29 = vld [vmem:[#allocation2 + $0x1a] sm:$0xff]  ;;  %v1540_v30 = vld [vmem:[#allocation2 + $0x22] sm:$0xff]  ;;  %v698_v2 = vpack.c.bf16 %v683_v28, %v682_v27  ;;  %v686_v36 = vld [vmem:[#allocation2 + $0x30] sm:$0xff] }
 0x124   : > { %2691 = vmatpush3.bf16.msra.mxu0 %v3029_v13  ;;  %v3364_v3 = vpack.c.bf16 %v1540_v30, %v1539_v29  ;;  %v685_v33 = vld [vmem:[#allocation2 + $0x20] sm:$0xff]  ;;  %v687_v37 = vld [vmem:[#allocation2 + $0x38] sm:$0xff]  ;;  %v3032_v44 = vld [vmem:[%s3574_s5 + $0x68] sm:$0xff]  }
 0x125   : > { %2692 = vmatprep.subr.bf16.mxu0 %v3030_v14  ;;  %v1542_v35 = vld [vmem:[#allocation2 + $0x3a] sm:$0xff]  ;;  %v1544_v39 = vld [vmem:[#allocation2 + $0x52] sm:$0xff]  ;;  %v3373_v40 = vpack.c.bf16 %v685_v33, %v684_v32  ;;  %v3377_v42 = vpack.c.bf16 %v687_v37, %v686_v36  ;;  %v3034_v45 = vld [vmem:[%s3574_s5 + $0x28] sm:$0xff]  }
 0x126   : > { %2773 = vmatpush3.bf16.msra.mxu1 %v3028_v9  ;;  %v3375_v41 = vpack.c.bf16 %v1542_v35, %v1541_v34  ;;  %v3379_v43 = vpack.c.bf16 %v1544_v39, %v1543_v38  ;;  %v688_v46 = vld [vmem:[#allocation2 + $0x48] sm:$0xff]  ;;  %v689_v47 = vld [vmem:[#allocation2 + $0x50] sm:$0xff]  ;;  %v690_v50 = vld [vmem:[#allocation2 + $0x60] sm:$0xff] }
 0x127   : > { %2790 = vmatprep.subr.bf16.mxu1 %v3031_v17  ;;  %v1545_v48 = vld [vmem:[#allocation2 + $0x62] sm:$0xff]  ;;  %v1546_v49 = vld [vmem:[#allocation2 + $0x6a] sm:$0xff]  ;;  %v1547_v52 = vld [vmem:[#allocation2 + $0x7a] sm:$0xff]  ;;  %v3398_v55 = vpack.c.bf16 %v689_v47, %v688_v46 }
 0x128   : > { %2693 = vmatpush3.bf16.msra.mxu0 %v3030_v14  ;;  %v691_v51 = vld [vmem:[#allocation2 + $0x68] sm:$0xff]  ;;  %v3035_v54 = vld [vmem:[%s3574_s5 + $0x70] sm:$0xff]   ;;  %v3403_v57 = vpack.c.bf16 %v1546_v49, %v1545_v48  ;;  %v692_v60 = vld [vmem:[#allocation2 + $0x78] sm:$0xff] }
 0x129   : > { %2679 = vmatmul.mubr.msk.bf16.gmra.mrb[20].mxu0 %vm550_vm3, %v3314_v7  ;;  %2759 = vmatmul.mubr.msk.bf16.gmra.mrb[8].mxu1 %vm550_vm3, %v3332_v15  ;;  %v1548_v53 = vld [vmem:[#allocation2 + $0x82] sm:$0xff]  ;;  %v3037_v56 = vld [vmem:[%s3574_s5 + $0x30] sm:$0xff]   ;;  %v3405_v58 = vpack.c.bf16 %v691_v51, %v690_v50  ;;  %v1550_v63 = vld [vmem:[#allocation2 + $0x9a] sm:$0xff] }
 0x12a   : > { %2682 = vmatprep.mubr.msk.bf16.mxu0 %vm550_vm3, %v3332_v15  ;;  %2762 = vmatprep.mubr.msk.bf16.mxu1 %vm550_vm3, %v3334_v16  ;;  %v3407_v59 = vpack.c.bf16 %v1548_v53, %v1547_v52  ;;  %v693_v61 = vld [vmem:[#allocation2 + $0x80] sm:$0xff]  ;;  %v1549_v62 = vld [vmem:[#allocation2 + $0x92] sm:$0xff]  ;;  %v1551_v5 = vld [vmem:[#allocation2 + $0xaa] sm:$0xff] }
 0x12b   : > { %2710 = vmatprep.subr.bf16.mxu0 %v3033_v25  ;;  %v694_v0 = vld [vmem:[#allocation2 + $0x90] sm:$0xff]  ;;  %v695_v1 = vld [vmem:[#allocation2 + $0x98] sm:$0xff]  ;;  %v3417_v8 = vpack.c.bf16 %v693_v61, %v692_v60  ;;  %v3419_v9 = vpack.c.bf16 %v1550_v63, %v1549_v62  ;;  %v696_v12 = vld [vmem:[#allocation2 + $0xa8] sm:$0xff] }
 0x12c   : > { %v1552_v6 = vld [vmem:[#allocation2 + $0xb2] sm:$0xff]  ;;  %v3421_v10 = vpack.c.bf16 %v695_v1, %v694_v0  ;;  %v1553_v14 = vld [vmem:[#allocation2 + $0xc2] sm:$0xff]  ;;  %v1006_v19 = vld [vmem:[#allocation2 + $0xa] sm:$0xff] }
 0x12d   : > { %v3423_v11 = vpack.c.bf16 %v1552_v6, %v1551_v5  ;;  %v697_v13 = vld [vmem:[#allocation2 + $0xb0] sm:$0xff]  ;;  %v1005_v18 = vld [vmem:[#allocation2 + $0x2] sm:$0xff]  ;;  %v3038_v26 = vld [vmem:[%s3574_s5 + $0x38] sm:$0xff]  }
 0x12e   : > { %v705_v20 = vpack.c.bf16 %v697_v13, %v696_v12  ;;  %v1021_v24 = vpack.c.bf16 %v1006_v19, %v1005_v18  ;;  %v3039_v27 = vld [vmem:[%s3574_s5 + $0x80] sm:$0xff]   ;;  %v1731_v29 = vld [vmem:[#allocation2 + $0xc8] sm:$0xff] }
 0x12f   : > { %v1730_v28 = vld [vmem:[#allocation2 + $0xc0] sm:$0xff]  ;;  %v3040_v33 = vld [vmem:[%s3574_s5 + $0x88] sm:$0xff]  }
 0x130   : > { %v1740_v30 = vpack.c.bf16 %v1731_v29, %v1730_v28 }
 0x131   : > { %2683 = vmatmul.mubr.msk.bf16.gmra.mrb[24].mxu0 %vm550_vm3, %v3334_v16  ;;  %2763 = vmatmul.mubr.msk.bf16.gmra.mrb[12].mxu1 %vm550_vm3, %v3347_v22 }
 0x132   : > { %2686 = vmatprep.mubr.msk.bf16.mxu0 %vm550_vm3, %v3347_v22  ;;  %2766 = vmatprep.mubr.msk.bf16.mxu1 %vm550_vm3, %v3349_v23 }
 0x139   : > { %2687 = vmatmul.mubr.msk.bf16.gmra.mrb[28].mxu0 %vm550_vm3, %v3349_v23  ;;  %2767 = vmatmul.mubr.msk.bf16.gmra.mrb[16].mxu1 %vm550_vm3, %v3362_v31 }
 0x13a   : > { %2694 = vmatprep.mubr.msk.bf16.mxu0 %vm550_vm3, %v698_v2  ;;  %2774 = vmatprep.mubr.msk.bf16.mxu1 %vm550_vm3, %v3364_v3  ;;  %v1732_v2 = vld [vmem:[#allocation2 + $0xd8] sm:$0xff] }
 0x141   : > { %2695 = vmatmul.mubr.msk.bf16.vlgmr.msra.gmra.mrb[16].mxu0 %vm550_vm3, %v3373_v40  ;;  %2775 = vmatmul.mubr.msk.bf16.vlgmr.msra.gmra.mrb[4].mxu1 %vm550_vm3, %v3375_v41 }
 0x142   : > { %2698 = vmatprep.mubr.msk.bf16.mxu0 %vm550_vm3, %v3377_v42  ;;  %2791 = vmatpush3.bf16.msra.mxu1 %v3031_v17  ;;  %v1554_v17 = vld [vmem:[#allocation2 + $0xca] sm:$0xff] }
 0x143   : > { %2778 = vmatprep.mubr.msk.bf16.mxu1 %vm550_vm3, %v3379_v43  ;;  %2792 = vmatprep.subr.bf16.mxu1 %v3032_v44  ;;  %v3433_v21 = vpack.c.bf16 %v1554_v17, %v1553_v14 }
 0x144   : > { %2711 = vmatpush3.bf16.msra.mxu0 %v3033_v25  ;;  %v3036_v25 = vld [vmem:[%s3574_s5 + $0x78] sm:$0xff]  }
 0x145   : > { %2712 = vmatprep.subr.bf16.mxu0 %v3034_v45 }
 0x146   : > { %2793 = vmatpush3.bf16.msra.mxu1 %v3032_v44 }
 0x147   : > { %2810 = vmatprep.subr.bf16.mxu1 %v3035_v54 }
 0x148   : > { %2713 = vmatpush3.bf16.msra.mxu0 %v3034_v45 }
 0x149   : > { %2699 = vmatmul.mubr.msk.bf16.gmra.mrb[20].mxu0 %vm550_vm3, %v3398_v55  ;;  %2730 = vmatprep.subr.bf16.mxu0 %v3037_v56 }
 0x14a   : > { %2779 = vmatmul.mubr.msk.bf16.gmra.mrb[8].mxu1 %vm550_vm3, %v3403_v57  ;;  %2702 = vmatprep.mubr.msk.bf16.mxu0 %vm550_vm3, %v3405_v58 }
 0x14b   : > { %2782 = vmatprep.mubr.msk.bf16.mxu1 %vm550_vm3, %v3407_v59 }
 0x151   : > { %2703 = vmatmul.mubr.msk.bf16.gmra.mrb[24].mxu0 %vm550_vm3, %v3417_v8 }
 0x152   : > { %2783 = vmatmul.mubr.msk.bf16.gmra.mrb[12].mxu1 %vm550_vm3, %v3419_v9  ;;  %2706 = vmatprep.mubr.msk.bf16.mxu0 %vm550_vm3, %v3421_v10 }
 0x153   : > { %2786 = vmatprep.mubr.msk.bf16.mxu1 %vm550_vm3, %v3423_v11 }
 0x159   : > { %2707 = vmatmul.mubr.msk.bf16.gmra.mrb[28].mxu0 %vm550_vm3, %v705_v20 }
 0x15a   : > { %2787 = vmatmul.mubr.msk.bf16.gmra.mrb[16].mxu1 %vm550_vm3, %v3433_v21  ;;  %2714 = vmatprep.mubr.msk.bf16.mxu0 %vm550_vm3, %v1021_v24 }
 0x15b   : > { %2794 = vmatprep.mubr.msk.bf16.mxu1 %vm550_vm3, %v3377_v42 }
 0x161   : > { %2715 = vmatmul.mubr.msk.bf16.vlgmr.msra.gmra.mrb[16].mxu0 %vm550_vm3, %v3364_v3  ;;  %v1733_v3 = vld [vmem:[#allocation2 + $0xe0] sm:$0xff] }
 0x162   : > { %2795 = vmatmul.mubr.msk.bf16.vlgmr.msra.gmra.mrb[4].mxu1 %vm550_vm3, %v3398_v55  ;;  %2718 = vmatprep.mubr.msk.bf16.mxu0 %vm550_vm3, %v3375_v41  ;;  %v1741_v32 = vpack.c.bf16 %v1733_v3, %v1732_v2 }
 0x163   : > { %2811 = vmatpush3.bf16.msra.mxu1 %v3035_v54  ;;  %2798 = vmatprep.mubr.msk.bf16.mxu1 %vm550_vm3, %v3405_v58 }
 0x164   : > { %2812 = vmatprep.subr.bf16.mxu1 %v3036_v25  ;;  %2731 = vmatpush3.bf16.msra.mxu0 %v3037_v56 }
 0x165   : > { %2732 = vmatprep.subr.bf16.mxu0 %v3038_v26 }
 0x167   : > { %2813 = vmatpush3.bf16.msra.mxu1 %v3036_v25 }
 0x168   : > { %2733 = vmatpush3.bf16.msra.mxu0 %v3038_v26  ;;  %2830 = vmatprep.subr.bf16.mxu1 %v3039_v27 }
 0x169   : > { %2719 = vmatmul.mubr.msk.bf16.gmra.mrb[20].mxu0 %vm550_vm3, %v3379_v43 }
 0x16a   : > { %2799 = vmatmul.mubr.msk.bf16.gmra.mrb[8].mxu1 %vm550_vm3, %v3417_v8  ;;  %2722 = vmatprep.mubr.msk.bf16.mxu0 %vm550_vm3, %v3403_v57 }
 0x16b   : > { %2802 = vmatprep.mubr.msk.bf16.mxu1 %vm550_vm3, %v3421_v10 }
 0x171   : > { %2723 = vmatmul.mubr.msk.bf16.gmra.mrb[24].mxu0 %vm550_vm3, %v3407_v59 }
 0x172   : > { %2803 = vmatmul.mubr.msk.bf16.gmra.mrb[12].mxu1 %vm550_vm3, %v705_v20  ;;  %2726 = vmatprep.mubr.msk.bf16.mxu0 %vm550_vm3, %v3419_v9 }
 0x173   : > { %2806 = vmatprep.mubr.msk.bf16.mxu1 %vm550_vm3, %v1740_v30 }
 0x179   : > { %2727 = vmatmul.mubr.msk.bf16.gmra.mrb[28].mxu0 %vm550_vm3, %v3423_v11 }
 0x17a   : > { %2807 = vmatmul.mubr.msk.bf16.gmra.mrb[16].mxu1 %vm550_vm3, %v1741_v32  ;;  %2734 = vmatprep.mubr.msk.bf16.mxu0 %vm550_vm3, %v3373_v40 }
 0x17b   : > { %2814 = vmatprep.mubr.msk.bf16.mxu1 %vm550_vm3, %v3311_v4  ;;  %v1910_v4 = vld [vmem:[#allocation2 + $0xd9] sm:$0xff] }
 0x181   : > { %2735 = vmatmul.mubr.msk.bf16.vlgmr.msra.gmra.mrb[16].mxu0 %vm550_vm3, %v3377_v42 }
 0x182   : > { %2815 = vmatmul.mubr.msk.bf16.vlgmr.msra.gmra.mrb[4].mxu1 %vm550_vm3, %v3314_v7  ;;  %2738 = vmatprep.mubr.msk.bf16.mxu0 %vm550_vm3, %v3398_v55  ;;  %v1911_v7 = vld [vmem:[#allocation2 + $0xe1] sm:$0xff] }
 0x183   : > { %2831 = vmatpush3.bf16.msra.mxu1 %v3039_v27  ;;  %2818 = vmatprep.mubr.msk.bf16.mxu1 %vm550_vm3, %v3332_v15  ;;  %v1919_v15 = vpack.c.bf16 %v1911_v7, %v1910_v4 }
 0x184   : > { %2832 = vmatprep.subr.bf16.mxu1 %v3040_v33 }
 0x187   : > { %2833 = vmatpush3.bf16.msra.mxu1 %v3040_v33 }
 0x189   : > { %2739 = vmatmul.mubr.msk.bf16.gmra.mrb[20].mxu0 %vm550_vm3, %v3405_v58 }
 0x18a   : > { %2819 = vmatmul.mubr.msk.bf16.gmra.mrb[8].mxu1 %vm550_vm3, %v3334_v16  ;;  %2742 = vmatprep.mubr.msk.bf16.mxu0 %vm550_vm3, %v3417_v8  ;;  %v2088_v16 = vld [vmem:[#allocation2 + $0xda] sm:$0xff] }
 0x18b   : > { %2822 = vmatprep.mubr.msk.bf16.mxu1 %vm550_vm3, %v3347_v22  ;;  %v2089_v22 = vld [vmem:[#allocation2 + $0xe2] sm:$0xff] }
 0x191   : > { %2743 = vmatmul.mubr.msk.bf16.gmra.mrb[24].mxu0 %vm550_vm3, %v3421_v10 }
 0x192   : > { %2823 = vmatmul.mubr.msk.bf16.gmra.mrb[12].mxu1 %vm550_vm3, %v3349_v23  ;;  %2746 = vmatprep.mubr.msk.bf16.mxu0 %vm550_vm3, %v705_v20  ;;  %v2097_v23 = vpack.c.bf16 %v2089_v22, %v2088_v16 }
 0x193   : > { %2826 = vmatprep.mubr.msk.bf16.mxu1 %vm550_vm3, %v3362_v31 }
 0x199   : > { %2747 = vmatmul.mubr.msk.bf16.gmra.mrb[28].mxu0 %vm550_vm3, %v1740_v30 }
 0x19a   : > { %2827 = vmatmul.mubr.msk.bf16.gmra.mrb[16].mxu1 %vm550_vm3, %v1919_v15 }
 0x19b   : > { %2834 = vmatprep.mubr.msk.bf16.mxu1 %vm550_vm3, %v3375_v41 }
 0x1a2   : > { %2835 = vmatmul.mubr.msk.bf16.vlgmr.msra.gmra.mrb[4].mxu1 %vm550_vm3, %v3379_v43 }
 0x1a3   : > { %2838 = vmatprep.mubr.msk.bf16.mxu1 %vm550_vm3, %v3403_v57 }
 0x1aa   : > { %2839 = vmatmul.mubr.msk.bf16.gmra.mrb[8].mxu1 %vm550_vm3, %v3407_v59 }
 0x1ab   : > { %2842 = vmatprep.mubr.msk.bf16.mxu1 %vm550_vm3, %v3419_v9 }
 0x1b2   : > { %2843 = vmatmul.mubr.msk.bf16.gmra.mrb[12].mxu1 %vm550_vm3, %v3423_v11 }
 0x1b3   : > { %2846 = vmatprep.mubr.msk.bf16.mxu1 %vm550_vm3, %v3433_v21 }
 0x1ba   : > { %2847 = vmatmul.mubr.msk.bf16.gmra.mrb[16].mxu1 %vm550_vm3, %v2097_v23 }
 0x254   : > { %v2736_v31 = vpop.f32.mrb[16].mxu0 }
 0x255   : > { %v1282_v34 = vpop.f32.mrb[17].mxu0 }
 0x256   : > { %v2737_v35 = vpop.f32.mrb[18].mxu0 }
 0x257   : > { %v1285_v36 = vpop.f32.mrb[19].mxu0 }
 0x25c   : > { %v2740_v37 = vpop.f32.mrb[20].mxu0 }
 0x25d   : > { %v1298_v38 = vpop.f32.mrb[21].mxu0 }
 0x25e   : > { %v2741_v39 = vpop.f32.mrb[22].mxu0 }
 0x25f   : > { %v1301_v40 = vpop.f32.mrb[23].mxu0 }
 0x264   : > { %v2744_v41 = vpop.f32.mrb[24].mxu0 }
 0x265   : > { %v1314_v42 = vpop.f32.mrb[25].mxu0 }
 0x266   : > { %v2745_v43 = vpop.f32.mrb[26].mxu0 }
 0x267   : > { %v1317_v44 = vpop.f32.mrb[27].mxu0 }
 0x26c   : > { %v2748_v45 = vpop.f32.mrb[28].mxu0 }
 0x26d   : > { %v1330_v46 = vpop.f32.mrb[29].mxu0 }
 0x26e   : > { %v2749_v47 = vpop.f32.mrb[30].mxu0 }
 0x26f   : > { %v1333_v48 = vpop.f32.mrb[31].mxu0 }
 0x275   : > { %v2836_v49 = vpop.f32.mrb[4].mxu1 }
 0x276   : > { %v2850_v50 = vadd.f32 %v2836_v49, %v2736_v31  ;;  %v2173_v51 = vpop.f32.mrb[5].mxu1 }
 0x277   : > { %v2851_v52 = vadd.f32 %v2173_v51, %v1282_v34  ;;  %v2837_v53 = vpop.f32.mrb[6].mxu1 }
 0x278   : > { %2255 = vst.msk [vmem:[%s3173_s20 + $0x10] sm:$0xff] %vm2252_vm6, %v2850_v50  ;;  %v2852_v54 = vadd.f32 %v2837_v53, %v2737_v35  ;;  %v2176_v55 = vpop.f32.mrb[7].mxu1 }
 0x279   : > { %2253 = vst.msk [vmem:[%s3173_s20] sm:$0xff] %vm2252_vm6, %v2851_v52  ;;  %v2853_v56 = vadd.f32 %v2176_v55, %v1285_v36 }
 0x27a   : > { %2256 = vst.msk [vmem:[%s3173_s20 + $0x18] sm:$0xff] %vm2252_vm6, %v2852_v54 }
 0x27b   : > { %2254 = vst.msk [vmem:[%s3173_s20 + $0x8] sm:$0xff] %vm2252_vm6, %v2853_v56 }
 0x27d   : > { %v2840_v57 = vpop.f32.mrb[8].mxu1 }
 0x27e   : > { %v2854_v58 = vadd.f32 %v2840_v57, %v2740_v37  ;;  %v2189_v59 = vpop.f32.mrb[9].mxu1 }
 0x27f   : > { %v2855_v60 = vadd.f32 %v2189_v59, %v1298_v38  ;;  %v2841_v61 = vpop.f32.mrb[10].mxu1 }
 0x280   : > { %2259 = vst.msk [vmem:[%s3173_s20 + $0x30] sm:$0xff] %vm2252_vm6, %v2854_v58  ;;  %v2856_v62 = vadd.f32 %v2841_v61, %v2741_v39  ;;  %v2192_v63 = vpop.f32.mrb[11].mxu1 }
 0x281   : > { %2257 = vst.msk [vmem:[%s3173_s20 + $0x20] sm:$0xff] %vm2252_vm6, %v2855_v60  ;;  %v2857_v0 = vadd.f32 %v2192_v63, %v1301_v40 }
 0x282   : > { %2260 = vst.msk [vmem:[%s3173_s20 + $0x38] sm:$0xff] %vm2252_vm6, %v2856_v62 }
 0x283   : > { %2258 = vst.msk [vmem:[%s3173_s20 + $0x28] sm:$0xff] %vm2252_vm6, %v2857_v0 }
 0x285   : > { %v2844_v1 = vpop.f32.mrb[12].mxu1 }
 0x286   : > { %v2858_v5 = vadd.f32 %v2844_v1, %v2744_v41  ;;  %v2205_v6 = vpop.f32.mrb[13].mxu1 }
 0x287   : > { %v2859_v8 = vadd.f32 %v2205_v6, %v1314_v42  ;;  %v2845_v9 = vpop.f32.mrb[14].mxu1 }
 0x288   : > { %2263 = vst.msk [vmem:[%s3173_s20 + $0x50] sm:$0xff] %vm2252_vm6, %v2858_v5  ;;  %v2860_v10 = vadd.f32 %v2845_v9, %v2745_v43  ;;  %v2208_v11 = vpop.f32.mrb[15].mxu1 }
 0x289   : > { %2261 = vst.msk [vmem:[%s3173_s20 + $0x40] sm:$0xff] %vm2252_vm6, %v2859_v8  ;;  %v2861_v12 = vadd.f32 %v2208_v11, %v1317_v44 }
 0x28a   : > { %2264 = vst.msk [vmem:[%s3173_s20 + $0x58] sm:$0xff] %vm2252_vm6, %v2860_v10 }
 0x28b   : > { %2262 = vst.msk [vmem:[%s3173_s20 + $0x48] sm:$0xff] %vm2252_vm6, %v2861_v12 }
 0x28d   : > { %v2848_v13 = vpop.f32.mrb[16].mxu1 }
 0x28e   : > { %v2862_v14 = vadd.f32 %v2848_v13, %v2748_v45  ;;  %v2221_v17 = vpop.f32.mrb[17].mxu1 }
 0x28f   : > { %v2863_v18 = vadd.f32 %v2221_v17, %v1330_v46  ;;  %v2849_v19 = vpop.f32.mrb[18].mxu1 }
 0x290   : > { %2267 = vst.msk [vmem:[%s3173_s20 + $0x70] sm:$0xff] %vm2252_vm6, %v2862_v14  ;;  %v2864_v20 = vadd.f32 %v2849_v19, %v2749_v47  ;;  %v2224_v21 = vpop.f32.mrb[19].mxu1 }
 0x291   : > { %2265 = vst.msk [vmem:[%s3173_s20 + $0x60] sm:$0xff] %vm2252_vm6, %v2863_v18  ;;  %v2865_v24 = vadd.f32 %v2224_v21, %v1333_v48 }
 0x292   : > { %2268 = vst.msk [vmem:[%s3173_s20 + $0x78] sm:$0xff] %vm2252_vm6, %v2864_v20 }
 0x293   : > { %2266 = vst.msk [vmem:[%s3173_s20 + $0x68] sm:$0xff] %vm2252_vm6, %v2865_v24 }
 0x294 PF: > { %s16_s25 = sadd.s32 1, %s3079_s25   ;;  %s3576_s21 = smov %s3071_s23 }
 0x295   : > { %p13_p10 = scmp.ge.s32.totalorder %s16_s25, 6   ;;  %s3577_s22 = smov %s3075_s24 }
 0x296   : > { %s3578_s23 = smov %s3581_s26  ;;  %s3579_s24 = smov %s3585_s27 }
 0x297   :  { %15 = sbr.rel (!%p13_p10) target bundleno = 3 (0x3), region = 96 }

</bundles_post_ra>
